<compile_context>
chip_gen: v6e
topology: v6e:2x2x1
jax: 0.10.0
libtpu: 0.0.40
codegen_flags: <defaults>
</compile_context>

<pallas_src>
import functools

import jax
import jax.numpy as jnp
from jax.experimental import pallas as pl
from jax.experimental.pallas import tpu as pltpu

LANE = 128
MIB = 1024 * 1024


def _round_up(x, m):
    return (x + m - 1) // m * m


def _pick_tiles(n, tile):
    """Node-axis padding and tile size (multiples of 128; >=2 row tiles when possible)."""
    tile_m = min(_round_up(tile, LANE), _round_up(n, LANE))
    if n > LANE and _round_up(n, tile_m) // tile_m < 2:
        tile_m = max(LANE, (tile_m // 2 // LANE) * LANE)
    n_pad = _round_up(n, tile_m)
    return n_pad, tile_m


# ----------------------------------------------------------------------------
# Host-side one-time preparation (hoisted out of the per-call kernel path).
# ----------------------------------------------------------------------------
def prepare_inputs(adj, feats, params, *, tile=512):
    n = adj.shape[0]
    n_pad, tile_m = _pick_tiles(n, tile)

    adj_pad = jnp.zeros((n_pad, n_pad), jnp.float32).at[:n, :n].set(adj.astype(jnp.float32))
    a_bf16 = adj_pad.astype(jnp.bfloat16)            # exact for {0,1}; +I added in-kernel
    inv_deg = 1.0 / (jnp.sum(adj_pad, axis=1, keepdims=True) + 1.0)

    h0 = jnp.zeros((n_pad, feats.shape[1]), jnp.float32).at[:n, :].set(feats)

    padded_params = []
    d_in_cur = feats.shape[1]
    for (w, b) in params:
        d_in, d_out = w.shape
        d_out_pad = _round_up(d_out, LANE)            # lane-dense (128-wide) outputs
        w_pad = jnp.zeros((d_in_cur, d_out_pad), jnp.float32).at[:d_in, :d_out].set(w)
        b_pad = jnp.zeros((1, d_out_pad), jnp.float32).at[:, :d_out].set(b)
        padded_params.append((w_pad, b_pad, d_out))
        d_in_cur = d_out_pad
    return dict(a=a_bf16, inv_deg=inv_deg, h0=h0, params=padded_params,
                n=n, n_pad=n_pad, tile_m=tile_m)


# ----------------------------------------------------------------------------
# Kernel 1: feature projection  hw = h @ W_pad   (lane-dense bf16 output)
# ----------------------------------------------------------------------------
def _project_kernel(h_ref, w_ref, o_ref):
    o_ref[...] = jnp.dot(h_ref[...], w_ref[...],
                         preferred_element_type=jnp.float32).astype(o_ref.dtype)


def project(h, w_pad, *, tile_m):
    n_pad, d_in = h.shape
    d_out = w_pad.shape[1]
    return pl.pallas_call(
        _project_kernel,
        out_shape=jax.ShapeDtypeStruct((n_pad, d_out), jnp.bfloat16),
        grid_spec=pltpu.PrefetchScalarGridSpec(
            num_scalar_prefetch=0,
            grid=(n_pad // tile_m,),
            in_specs=[
                pl.BlockSpec((tile_m, d_in), lambda i: (i, 0)),
                pl.BlockSpec((d_in, d_out), lambda i: (0, 0)),   # W resident in VMEM
            ],
            out_specs=pl.BlockSpec((tile_m, d_out), lambda i: (i, 0)),
        ),
        compiler_params=pltpu.CompilerParams(dimension_semantics=("parallel",)),
    )(h, w_pad)


# ----------------------------------------------------------------------------
# Kernel 2: tiled aggregation  out = ((A + I) @ hw) * inv_deg + b  (+ optional ReLU)
# ----------------------------------------------------------------------------
def _aggregate_kernel_resident(a_ref, hw_ref, invdeg_ref, b_ref, o_ref, acc_ref,
                               *, tile_m, tile_k, apply_relu):
    i = pl.program_id(0)
    k = pl.program_id(1)

    @pl.when(k == 0)
    def _():
        # Self-loop (A_hat = A + I): seed the accumulator with this row block of hw.
        row = pl.multiple_of(i * tile_m, tile_m)
        acc_ref[...] = hw_ref[pl.ds(row, tile_m), :].astype(jnp.float32)

    col = pl.multiple_of(k * tile_k, tile_k)
    acc_ref[...] += jnp.dot(a_ref[...], hw_ref[pl.ds(col, tile_k), :],
                            preferred_element_type=jnp.float32)

    @pl.when(k == pl.num_programs(1) - 1)
    def _():
        out = acc_ref[...] * invdeg_ref[...] + b_ref[...]
        if apply_relu:
            out = jnp.maximum(out, 0.0)
        o_ref[...] = out.astype(o_ref.dtype)


def _aggregate_kernel_streamed(a_ref, hw_ref, invdeg_ref, b_ref, o_ref, acc_ref,
                               *, apply_relu):
    i = pl.program_id(0)
    k = pl.program_id(1)

    @pl.when(k == 0)
    def _():
        acc_ref[...] = jnp.zeros_like(acc_ref)

    # Self-loop on the diagonal tile (requires tile_m == tile_k).
    @pl.when(i == k)
    def _():
        acc_ref[...] += hw_ref[...].astype(jnp.float32)

    acc_ref[...] += jnp.dot(a_ref[...], hw_ref[...],
                            preferred_element_type=jnp.float32)

    @pl.when(k == pl.num_programs(1) - 1)
    def _():
        out = acc_ref[...] * invdeg_ref[...] + b_ref[...]
        if apply_relu:
            out = jnp.maximum(out, 0.0)
        o_ref[...] = out.astype(o_ref.dtype)


def aggregate(a_bf16, hw, inv_deg, b_pad, *, apply_relu, tile_m, tile_k, out_dtype):
    n_pad = a_bf16.shape[0]
    d_out = hw.shape[1]
    out_itemsize = jnp.dtype(out_dtype).itemsize

    # hw VMEM residency removes the 128/tile_m re-read of hw per row tile.
    hw_bytes_full = n_pad * d_out * hw.dtype.itemsize
    hw_resident = hw_bytes_full <= 24 * MIB          # conservative for v7x's 64 MiB VMEM

    # Right-size the VMEM limit from the actual (double-buffered) footprint.
    a_bytes = 2 * tile_m * tile_k * 2                              # bf16 A tiles, 2 bufs
    hw_bytes = hw_bytes_full if hw_resident else 2 * tile_k * d_out * hw.dtype.itemsize
    acc_bytes = tile_m * d_out * 4
    out_bytes = 2 * tile_m * d_out * out_itemsize
    misc_bytes = 4 * tile_m * 4 + 2 * d_out * 4                    # inv_deg, bias
    needed = a_bytes + hw_bytes + acc_bytes + out_bytes + misc_bytes
    vmem_limit = min(100 * MIB, max(32 * MIB, int(1.5 * needed) + 4 * MIB))

    if hw_resident:
        kernel = functools.partial(_aggregate_kernel_resident,
                                   tile_m=tile_m, tile_k=tile_k, apply_relu=apply_relu)
        hw_spec = pl.BlockSpec((n_pad, d_out), lambda i, k: (0, 0))   # fully resident
    else:
        # TODO(synk): for very large N, fuse the projection into this kernel to also
        # drop the hw HBM round-trip entirely.
        kernel = functools.partial(_aggregate_kernel_streamed, apply_relu=apply_relu)
        hw_spec = pl.BlockSpec((tile_k, d_out), lambda i, k: (k, 0))  # streamed per k

    return pl.pallas_call(
        kernel,
        out_shape=jax.ShapeDtypeStruct((n_pad, d_out), out_dtype),
        grid_spec=pltpu.PrefetchScalarGridSpec(
            num_scalar_prefetch=0,
            grid=(n_pad // tile_m, n_pad // tile_k),
            in_specs=[
                pl.BlockSpec((tile_m, tile_k), lambda i, k: (i, k)),   # A tile (bf16)
                hw_spec,
                pl.BlockSpec((tile_m, 1), lambda i, k: (i, 0)),        # inv_deg
                pl.BlockSpec((1, d_out), lambda i, k: (0, 0)),         # bias resident
            ],
            out_specs=pl.BlockSpec((tile_m, d_out), lambda i, k: (i, 0)),
            scratch_shapes=[pltpu.VMEM((tile_m, d_out), jnp.float32)],
        ),
        compiler_params=pltpu.CompilerParams(
            dimension_semantics=("parallel", "arbitrary"),
            vmem_limit_bytes=vmem_limit),
    )(a_bf16, hw, inv_deg, b_pad)


# ----------------------------------------------------------------------------
# Forward pass
# ----------------------------------------------------------------------------
def graphsage_forward_prepared(prep, *, num_layers):
    """Kernel-only forward over pre-padded inputs (prep reusable across calls)."""
    a = prep["a"]
    inv_deg = prep["inv_deg"]
    tile_m = prep["tile_m"]
    n = prep["n"]
    h = prep["h0"]

    h_list = []
    for l, (w_pad, b_pad, d_out) in enumerate(prep["params"]):
        is_last = (l == num_layers - 1)
        hw = project(h, w_pad, tile_m=tile_m)                        # (n_pad, 128) bf16
        h = aggregate(a, hw, inv_deg, b_pad,
                      apply_relu=not is_last,
                      tile_m=tile_m, tile_k=tile_m,
                      out_dtype=jnp.float32 if is_last else jnp.bfloat16)
        # TODO(synk): nn.Dropout skipped (inference / eval-mode identity).
        h_list.append(h[:n, :d_out].astype(jnp.float32))
    return h_list, h_list[-1]


def graphsage_forward(adj, feats, params, *, num_layers, tile=512):
    """Equivalent of GraphSAGE.forward(g, feats) -> (h_list, h). Activation = ReLU."""
    prep = prepare_inputs(adj, feats, params, tile=tile)
    return graphsage_forward_prepared(prep, num_layers=num_layers)


def init_params(key, num_layers, input_dim, hidden_dim, output_dim):
    """Deterministic per-layer (W^T, b) matching SAGEConv.fc_neigh shapes."""
    dims = []
    if num_layers == 1:
        dims.append((input_dim, output_dim))
    else:
        dims.append((input_dim, hidden_dim))
        for _ in range(num_layers - 2):
            dims.append((hidden_dim, hidden_dim))
        dims.append((hidden_dim, output_dim))
    params = []
    for (d_in, d_out) in dims:
        key, kw, kb = jax.random.split(key, 3)
        scale = 1.0 / jnp.sqrt(jnp.float32(d_in))
        w = jax.random.uniform(kw, (d_in, d_out), jnp.float32, -scale, scale)
        b = jax.random.uniform(kb, (1, d_out), jnp.float32, -scale, scale)
        params.append((w, b))
    return params


def reference_forward(adj, feats, params, num_layers):
    """Pure-JAX reference of the original semantics (f32 throughout)."""
    deg = jnp.sum(adj, axis=1, keepdims=True)
    h = feats
    h_list = []
    for l, (w, b) in enumerate(params):
        agg = (adj @ h + h) / (deg + 1.0)
        h = agg @ w + b
        if l != num_layers - 1:
            h = jnp.maximum(h, 0.0)
        h_list.append(h)
    return h_list, h


if __name__ == "__main__":
    N = 512           # number of graph nodes
    INPUT_DIM = 16
    HIDDEN_DIM = 32
    OUTPUT_DIM = 8
    NUM_LAYERS = 2

    key = jax.random.PRNGKey(0)
    key, k_adj, k_feat, k_par = jax.random.split(key, 4)

    # Random directed graph as a dense adjacency matrix A[dst, src] in {0, 1}.
    adj = (jax.random.uniform(k_adj, (N, N)) < 0.15).astype(jnp.float32)
    adj = adj * (1.0 - jnp.eye(N, dtype=jnp.float32))  # no explicit self loops

    feats = jax.random.normal(k_feat, (N, INPUT_DIM), jnp.float32)
    params = init_params(k_par, NUM_LAYERS, INPUT_DIM, HIDDEN_DIM, OUTPUT_DIM)

    h_list, h = graphsage_forward(adj, feats, params, num_layers=NUM_LAYERS)
    jax.block_until_ready(h)
    for hl in h_list:
        jax.block_until_ready(hl)

    # Validate against the pure-JAX reference (bf16 adjacency / hw / intermediate h).
    ref_list, ref_h = reference_forward(adj, feats, params, NUM_LAYERS)
    for got, want in zip(h_list, ref_list):
        assert got.shape == want.shape
        err = float(jnp.max(jnp.abs(got - want)))
        scale = float(jnp.max(jnp.abs(want))) + 1e-6
        assert err / scale < 3e-2, f"mismatch: max abs err {err} (scale {scale})"

    assert h.shape == (N, OUTPUT_DIM)
    assert h_list[0].shape == (N, HIDDEN_DIM)
    print("KERNEL_OK")
</pallas_src>

<mosaic_0001>
module attributes {stable_mosaic.version = 11 : i64} {
  func.func @_project_kernel(%arg0: i32, %arg1: memref<256x16xf32, #tpu.memory_space<vmem>>, %arg2: memref<16x128xf32, #tpu.memory_space<vmem>>, %arg3: memref<256x128xbf16, #tpu.memory_space<vmem>>) attributes {dimension_semantics = [#tpu.dimension_semantics<parallel>], iteration_bounds = array<i64: 2>, scalar_prefetch = 0 : i64, scratch_operands = 0 : i64, tpu.core_type = #tpu.core_type<tc>, window_params = [{transform_indices = @transform_0, window_bounds = array<i64: 256, 16>}, {pipeline_mode = #tpu.pipeline_mode<synchronous>, transform_indices = @transform_1, window_bounds = array<i64: 16, 128>}, {transform_indices = @transform_2, window_bounds = array<i64: 256, 128>}]} {
    %c0 = arith.constant 0 : index
    %c0_0 = arith.constant 0 : index
    %0 = vector.load %arg1[%c0, %c0_0] : memref<256x16xf32, #tpu.memory_space<vmem>>, vector<256x16xf32>
    %c0_1 = arith.constant 0 : index
    %c0_2 = arith.constant 0 : index
    %1 = vector.load %arg2[%c0_1, %c0_2] : memref<16x128xf32, #tpu.memory_space<vmem>>, vector<16x128xf32>
    %cst = arith.constant dense<0.000000e+00> : vector<256x128xf32>
    %2 = tpu.matmul %0, %1, %cst {dimension_numbers = #tpu.dot_dimension_numbers<[1], [0], [0], [1], [0, 0, 1, 1], [], []>} : vector<256x16xf32>, vector<16x128xf32>, vector<256x128xf32> -> vector<256x128xf32>
    %3 = arith.truncf %2 : vector<256x128xf32> to vector<256x128xbf16>
    %c0_3 = arith.constant 0 : index
    %c0_4 = arith.constant 0 : index
    %4 = vector.load %arg3[%c0_3, %c0_4] : memref<256x128xbf16, #tpu.memory_space<vmem>>, vector<256x128xbf16>
    tpu.vector_store %arg3[%c0_3, %c0_4], %3 {strides = array<i32>} : memref<256x128xbf16, #tpu.memory_space<vmem>>, vector<256x128xbf16>,
    return
  }
  func.func @transform_0(%arg0: i32) -> (i32, i32) {
    %c0_i32 = arith.constant 0 : i32
    %c0_i32_0 = arith.constant 0 : i32
    return %arg0, %c0_i32 : i32, i32
  }
  func.func @transform_1(%arg0: i32) -> (i32, i32) {
    %c0_i32 = arith.constant 0 : i32
    %c0_i32_0 = arith.constant 0 : i32
    %c0_i32_1 = arith.constant 0 : i32
    return %c0_i32, %c0_i32_0 : i32, i32
  }
  func.func @transform_2(%arg0: i32) -> (i32, i32) {
    %c0_i32 = arith.constant 0 : i32
    %c0_i32_0 = arith.constant 0 : i32
    return %arg0, %c0_i32 : i32, i32
  }
}

</mosaic_0001>

<bundles_post_ra>
// kernel: tpu_custom_call.1
= control target key start
LH: loop header
LB: loop body
LE: loop exit
PB: predicated region body
PF: predicated region fallthrough
CT: control target
= control target key end

     0   :  { %7 = vsyncpa [#allocation3], 0  ;;  %s1348_s0 = inlined_call_operand.vmem [shape: f32[512,16], index: 0, kind: input, shape index: {}]   ;;  %s1349_s1 = inlined_call_operand.vmem [shape: f32[16,128], index: 1, kind: input, shape index: {}]   ;;  %s1350_s2 = inlined_call_operand.hbm [shape: bf16[512,128], index: 2, kind: output, shape index: {}]  }
   0x1   :  { %9 = vsyncpa [#allocation3 + $0x1], 0  ;;  %s1152_s9 = smov 0   ;;  %s1154_s10 = smov 0  }
   0x2   :  { %s1156_s11 = smov 0   ;;  %s1158_s12 = smov 0  }
   0x3 LB: > { %s1173_s13 = sadd.s32 4294967295, %s1132_s12   ;;  %s737_s14 = sadd.s32 4294967294, %s1132_s12   ;;  %s1132_s12 = sphi %s1158_s12, %s1356_s12   ;;  %s1128_s11 = sphi %s1156_s11, %s1355_s11   ;;  %s1124_s10 = sphi %s1154_s10, %s1354_s10   ;;  %s1120_s9 = sphi %s1152_s9, %s1353_s9  }
   0x4   : > { %s1177_s15 = sadd.s32 1, %s1132_s12   ;;  %s69_s16 = sadd.s32 1, %s1128_s11 }
   0x5   : > { %s66_s17 = ssub.s32 %s1132_s12, %s1177_s15  ;;  %p79_p0 = scmp.ne.s32.totalorder %s1128_s11, %s1124_s10 }
   0x6   : > { %p67_p1 = scmp.eq.s32.totalorder %s66_s17, 0  ;;  %p80_p2 = scmp.eq.s32.totalorder %s1173_s13, 1 }
   0x7   : > { %p85_p3 = scmp.ne.s32.totalorder %s1124_s10, %s1120_s9  ;;  %p86_p4 = scmp.eq.s32.totalorder %s737_s14, 1 }
   0x8   : > { %s1188_s18 = scalar_select %p67_p1, %s1128_s11, %s69_s16  }
   0x9   : > { %p1190_p5 = por %p80_p2, %p79_p0  ;;  %p1194_p6 = por %p86_p4, %p85_p3 }
   0xa   : > { %p740_p7 = scmp.ge.s32.totalorder %s1132_s12, 1  ;;  %p116_p8 = scmp.lt.s32.totalorder %s1132_s12, 3 }
   0xc   : > { %p117_p9 = pnand %p740_p7, %p116_p8 }
   0xd   : > { %s742_s25 = sshll.u32 (!%p117_p9), %s1173_s13, 5  ;;  %s135_s30 = sand.u32 (!%p117_p9), 1, %s1124_s10  }
   0xe   : > { %120 = sbr.rel (%p117_p9) target bundleno = 264 (0x108), region = 28  ;;  %p139_p10 = scmp.lt.s32.totalorder (!%p117_p9), %s742_s25, 63 }
   0xf   : > { %s741_s3 = sshll.u32 (!%p117_p9), %s135_s30, 7  ;;  %s845_s5 = sshll.u32 (!%p117_p9), %s1173_s13, 11 }
  0x10   : > { %s1279_s4 = scalar_lea.vmem (!%p117_p9), [#allocation2], %s741_s3  ;;  %s1300_s14 = scalar_lea.hbm (!%p117_p9), %s1350_s2, %s845_s5 }
  0x11   : > { %s675_s6 = sshll.u32 (!%p117_p9), %s1279_s4, 4  ;;  %s1308_s13 = scalar_lea.sflag (!%p117_p9), [#allocation3], %s135_s30  ;;  %s1302_s6 = int_to_ptr.vmem [resolvable:$true] %s675_s6 }
  0x12   : > { %s1072_s16 = scalar_lea.vmem (!%p117_p9), %s1302_s6, 2048  ;;  %s1134_s17 = smov (!%p117_p9), [#allocation2]  }
  0x13   : > { %v178_v0 = vld [vmem:[%s1349_s1 + $0x8] sm:$0xff]  ;;  %v177_v1 = vld [vmem:[%s1349_s1] sm:$0xff]  ;;  %s1358_s25 = smov (!%p139_p10, %s742_s25), 63  ;;  %vm179_vm0 = vcmask 130048   ;;  %p1073_p11 = scmp.ne.s32.totalorder %s1302_s6, %s1072_s16 }
  0x14   : > { %975 = vmatprep.subr.mxu0 %v178_v0  ;;  %1027 = vmatprep.subr.mxu1 %v178_v0  ;;  %s743_s26 = sshll.u32 %s1358_s25, 3  ;;  %s1076_s21 = sshll.u32 %s1134_s17, 4  ;;  %s1077_s21 = int_to_ptr.vmem [resolvable:$false] %s1076_s21 }
  0x15   : > { %976 = vmatpush3.msra.mxu0 %v178_v0  ;;  %1029 = vmatpush3.msra.mxu1 %v178_v0  ;;  %s1210_s29 = scalar_lea.vmem %s1348_s0, %s743_s26  ;;  %p1074_p12 = pnand %p1073_p11, %p1190_p5 }
  0x16   : > { %977 = vmatprep.subr.mxu0 %v177_v1  ;;  %1028 = vmatprep.subr.mxu1 %v177_v1  ;;  %v145_v2 = vld [vmem:[%s1210_s29] sm:$0xff]  ;;  %v146_v4 = vld [vmem:[%s1210_s29 + $0x8] sm:$0xff]  ;;  %v147_v6 = vld [vmem:[%s1210_s29 + $0x10] sm:$0xff]  ;;  %s1078_s22 = scalar_lea.vmem %s1077_s21, 4096  ;;  %p1079_p0 = scmp.lt.s32.totalorder %s1302_s6, %s1077_s21 }
  0x17   : > { %978 = vmatpush3.msra.mxu0 %v177_v1  ;;  %1030 = vmatpush3.msra.mxu1 %v177_v1  ;;  %v161_v3 = vld [vmem:[%s1210_s29 + $0x80] sm:$0xff]  ;;  %v162_v5 = vld [vmem:[%s1210_s29 + $0x88] sm:$0xff]  ;;  %v163_v7 = vld [vmem:[%s1210_s29 + $0x90] sm:$0xff]  ;;  %p1075_p13 = pneg %p1074_p12  ;;  %p1080_p1 = scmp.lt.s32.totalorder %s1078_s22, %s1072_s16 }
  0x18   : > { %979 = vmatprep.mubr.msk.f32.mxu0 %vm179_vm0, %v145_v2  ;;  %1003 = vmatprep.mubr.msk.f32.mxu1 %vm179_vm0, %v161_v3  ;;  %v148_v8 = vld [vmem:[%s1210_s29 + $0x18] sm:$0xff]  ;;  %v149_v10 = vld [vmem:[%s1210_s29 + $0x20] sm:$0xff]  ;;  %v150_v12 = vld [vmem:[%s1210_s29 + $0x28] sm:$0xff] }
  0x19   : > { %980 = vmatmul.mubr.msk.f32.vlgmr.msra.gmra.mxu0 %vm179_vm0, %v146_v4  ;;  %1004 = vmatmul.mubr.msk.f32.vlgmr.msra.gmra.mxu1 %vm179_vm0, %v162_v5  ;;  %v164_v9 = vld [vmem:[%s1210_s29 + $0x98] sm:$0xff]  ;;  %v165_v11 = vld [vmem:[%s1210_s29 + $0xa0] sm:$0xff]  ;;  %v166_v13 = vld [vmem:[%s1210_s29 + $0xa8] sm:$0xff]  ;;  %p1081_p2 = por %p1080_p1, %p1079_p0 }
  0x1a   : > { %982 = vmatprep.mubr.msk.f32.mxu0 %vm179_vm0, %v147_v6  ;;  %1006 = vmatprep.mubr.msk.f32.mxu1 %vm179_vm0, %v163_v7  ;;  %v151_v14 = vld [vmem:[%s1210_s29 + $0x30] sm:$0xff]  ;;  %v152_v16 = vld [vmem:[%s1210_s29 + $0x38] sm:$0xff]  ;;  %v153_v18 = vld [vmem:[%s1210_s29 + $0x40] sm:$0xff] }
  0x1b   : > { %v167_v15 = vld [vmem:[%s1210_s29 + $0xb0] sm:$0xff]  ;;  %v168_v17 = vld [vmem:[%s1210_s29 + $0xb8] sm:$0xff]  ;;  %v169_v19 = vld [vmem:[%s1210_s29 + $0xc0] sm:$0xff]  ;;  %p1082_p3 = pnand %p1081_p2, %p1075_p13 }
  0x1c   : > { %v154_v20 = vld [vmem:[%s1210_s29 + $0x48] sm:$0xff]  ;;  %v155_v22 = vld [vmem:[%s1210_s29 + $0x50] sm:$0xff]  ;;  %v156_v24 = vld [vmem:[%s1210_s29 + $0x58] sm:$0xff] }
  0x1d   : > { %983 = vmatmul.mubr.msk.f32.gmra.mxu0 %vm179_vm0, %v148_v8  ;;  %1007 = vmatmul.mubr.msk.f32.gmra.mxu1 %vm179_vm0, %v164_v9  ;;  %v170_v21 = vld [vmem:[%s1210_s29 + $0xc8] sm:$0xff]  ;;  %v171_v23 = vld [vmem:[%s1210_s29 + $0xd0] sm:$0xff]  ;;  %v172_v25 = vld [vmem:[%s1210_s29 + $0xd8] sm:$0xff] }
  0x1e   : > { %985 = vmatprep.mubr.msk.f32.mxu0 %vm179_vm0, %v149_v10  ;;  %1009 = vmatprep.mubr.msk.f32.mxu1 %vm179_vm0, %v165_v11  ;;  %v157_v26 = vld [vmem:[%s1210_s29 + $0x60] sm:$0xff]  ;;  %v158_v28 = vld [vmem:[%s1210_s29 + $0x68] sm:$0xff]  ;;  %v159_v30 = vld [vmem:[%s1210_s29 + $0x70] sm:$0xff] }
  0x1f   : > { %v173_v27 = vld [vmem:[%s1210_s29 + $0xe0] sm:$0xff]  ;;  %v174_v29 = vld [vmem:[%s1210_s29 + $0xe8] sm:$0xff]  ;;  %v175_v31 = vld [vmem:[%s1210_s29 + $0xf0] sm:$0xff] }
  0x20   : > { %v160_v32 = vld [vmem:[%s1210_s29 + $0x78] sm:$0xff] }
  0x21   : > { %986 = vmatmul.mubr.msk.f32.gmra.mxu0 %vm179_vm0, %v150_v12  ;;  %1010 = vmatmul.mubr.msk.f32.gmra.mxu1 %vm179_vm0, %v166_v13  ;;  %v176_v33 = vld [vmem:[%s1210_s29 + $0xf8] sm:$0xff] }
  0x22   : > { %988 = vmatprep.mubr.msk.f32.mxu0 %vm179_vm0, %v151_v14  ;;  %1012 = vmatprep.mubr.msk.f32.mxu1 %vm179_vm0, %v167_v15 }
  0x25   : > { %989 = vmatmul.mubr.msk.f32.gmra.mxu0 %vm179_vm0, %v152_v16  ;;  %1013 = vmatmul.mubr.msk.f32.gmra.mxu1 %vm179_vm0, %v168_v17 }
  0x26   : > { %991 = vmatprep.mubr.msk.f32.mxu0 %vm179_vm0, %v153_v18  ;;  %1015 = vmatprep.mubr.msk.f32.mxu1 %vm179_vm0, %v169_v19 }
  0x29   : > { %992 = vmatmul.mubr.msk.f32.gmra.mxu0 %vm179_vm0, %v154_v20  ;;  %1016 = vmatmul.mubr.msk.f32.gmra.mxu1 %vm179_vm0, %v170_v21 }
  0x2a   : > { %994 = vmatprep.mubr.msk.f32.mxu0 %vm179_vm0, %v155_v22  ;;  %1018 = vmatprep.mubr.msk.f32.mxu1 %vm179_vm0, %v171_v23 }
  0x2d   : > { %995 = vmatmul.mubr.msk.f32.gmra.mxu0 %vm179_vm0, %v156_v24  ;;  %1019 = vmatmul.mubr.msk.f32.gmra.mxu1 %vm179_vm0, %v172_v25 }
  0x2e   : > { %997 = vmatprep.mubr.msk.f32.mxu0 %vm179_vm0, %v157_v26  ;;  %1021 = vmatprep.mubr.msk.f32.mxu1 %vm179_vm0, %v173_v27 }
  0x31   : > { %998 = vmatmul.mubr.msk.f32.gmra.mxu0 %vm179_vm0, %v158_v28  ;;  %1022 = vmatmul.mubr.msk.f32.gmra.mxu1 %vm179_vm0, %v174_v29 }
  0x32   : > { %1000 = vmatprep.mubr.msk.f32.mxu0 %vm179_vm0, %v159_v30  ;;  %1024 = vmatprep.mubr.msk.f32.mxu1 %vm179_vm0, %v175_v31 }
  0x35   : > { %1001 = vmatmul.mubr.msk.f32.gmra.mxu0 %vm179_vm0, %v160_v32  ;;  %1025 = vmatmul.mubr.msk.f32.gmra.mxu1 %vm179_vm0, %v176_v33 }
  0xd9   : > { %v981_v34 = vpop.f32.mrf.mxu0  ;;  %v1005_v35 = vpop.f32.mrf.mxu1 }
  0xdb   : > { %v342_v36 = vpop.f32.mrf.mxu0  ;;  %v422_v37 = vpop.f32.mrf.mxu1 }
  0xdc   : > { %v849_v38 = vpack.c.bf16 %v981_v34, %v342_v36  ;;  %v889_v39 = vpack.c.bf16 %v1005_v35, %v422_v37 }
  0xdd   : > { %v984_v40 = vpop.f32.mrf.mxu0  ;;  %v1008_v41 = vpop.f32.mrf.mxu1 }
  0xde   : > { %850 = vst [vmem:[%s1279_s4] sm:$0xff] %v849_v38   ;;  %933 = vst [vmem:[%s1279_s4 + $0x40] sm:$0xff] %v889_v39  }
  0xdf   : > { %v352_v42 = vpop.f32.mrf.mxu0  ;;  %v432_v43 = vpop.f32.mrf.mxu1 }
  0xe0   : > { %v854_v44 = vpack.c.bf16 %v984_v40, %v352_v42  ;;  %v894_v45 = vpack.c.bf16 %v1008_v41, %v432_v43 }
  0xe1   : > { %v987_v46 = vpop.f32.mrf.mxu0  ;;  %v1011_v47 = vpop.f32.mrf.mxu1 }
  0xe2   : > { %926 = vst [vmem:[%s1279_s4 + $0x8] sm:$0xff] %v854_v44   ;;  %934 = vst [vmem:[%s1279_s4 + $0x48] sm:$0xff] %v894_v45  }
  0xe3   : > { %v362_v48 = vpop.f32.mrf.mxu0  ;;  %v442_v49 = vpop.f32.mrf.mxu1 }
  0xe4   : > { %v859_v50 = vpack.c.bf16 %v987_v46, %v362_v48  ;;  %v899_v51 = vpack.c.bf16 %v1011_v47, %v442_v49 }
  0xe5   : > { %v990_v52 = vpop.f32.mrf.mxu0  ;;  %v1014_v53 = vpop.f32.mrf.mxu1 }
  0xe6   : > { %927 = vst [vmem:[%s1279_s4 + $0x10] sm:$0xff] %v859_v50   ;;  %935 = vst [vmem:[%s1279_s4 + $0x50] sm:$0xff] %v899_v51  }
  0xe7   : > { %v372_v54 = vpop.f32.mrf.mxu0  ;;  %v452_v55 = vpop.f32.mrf.mxu1 }
  0xe8   : > { %v864_v56 = vpack.c.bf16 %v990_v52, %v372_v54  ;;  %v904_v57 = vpack.c.bf16 %v1014_v53, %v452_v55 }
  0xe9   : > { %v993_v58 = vpop.f32.mrf.mxu0  ;;  %v1017_v59 = vpop.f32.mrf.mxu1 }
  0xea   : > { %928 = vst [vmem:[%s1279_s4 + $0x18] sm:$0xff] %v864_v56   ;;  %936 = vst [vmem:[%s1279_s4 + $0x58] sm:$0xff] %v904_v57  }
  0xeb   : > { %v382_v60 = vpop.f32.mrf.mxu0  ;;  %v462_v61 = vpop.f32.mrf.mxu1 }
  0xec   : > { %v869_v62 = vpack.c.bf16 %v993_v58, %v382_v60  ;;  %v909_v63 = vpack.c.bf16 %v1017_v59, %v462_v61 }
  0xed   : > { %v996_v0 = vpop.f32.mrf.mxu0  ;;  %v1020_v1 = vpop.f32.mrf.mxu1 }
  0xee   : > { %929 = vst [vmem:[%s1279_s4 + $0x20] sm:$0xff] %v869_v62   ;;  %937 = vst [vmem:[%s1279_s4 + $0x60] sm:$0xff] %v909_v63  }
  0xef   : > { %v392_v2 = vpop.f32.mrf.mxu0  ;;  %v472_v3 = vpop.f32.mrf.mxu1 }
  0xf0   : > { %v874_v4 = vpack.c.bf16 %v996_v0, %v392_v2  ;;  %v914_v5 = vpack.c.bf16 %v1020_v1, %v472_v3 }
  0xf1   : > { %v999_v6 = vpop.f32.mrf.mxu0  ;;  %v1023_v7 = vpop.f32.mrf.mxu1 }
  0xf2   : > { %930 = vst [vmem:[%s1279_s4 + $0x28] sm:$0xff] %v874_v4   ;;  %938 = vst [vmem:[%s1279_s4 + $0x68] sm:$0xff] %v914_v5  }
  0xf3   : > { %v402_v8 = vpop.f32.mrf.mxu0  ;;  %v482_v9 = vpop.f32.mrf.mxu1 }
  0xf4   : > { %v879_v10 = vpack.c.bf16 %v999_v6, %v402_v8  ;;  %v919_v11 = vpack.c.bf16 %v1023_v7, %v482_v9 }
  0xf5   : > { %v1002_v12 = vpop.f32.mrf.mxu0  ;;  %v1026_v13 = vpop.f32.mrf.mxu1 }
  0xf6   : > { %931 = vst [vmem:[%s1279_s4 + $0x30] sm:$0xff] %v879_v10   ;;  %939 = vst [vmem:[%s1279_s4 + $0x70] sm:$0xff] %v919_v11  }
  0xf7   : > { %v412_v14 = vpop.f32.mrf.mxu0  ;;  %v492_v15 = vpop.f32.mrf.mxu1 }
  0xf8   : > { %v884_v16 = vpack.c.bf16 %v1002_v12, %v412_v14  ;;  %v924_v17 = vpack.c.bf16 %v1026_v13, %v492_v15 }
  0xfa   : > { %932 = vst [vmem:[%s1279_s4 + $0x38] sm:$0xff] %v884_v16   ;;  %940 = vst [vmem:[%s1279_s4 + $0x78] sm:$0xff] %v924_v17  }
  0xfb   : > { %1085 = shalt.err (!%p1082_p3)
}
  0xfc   : > { %s1086_s23 = scalar_lea.hbm %s1300_s14, 2048  ;;  %s1090_s26 = scalar_lea.hbm %s1350_s2, 4096 }
  0xfd   : > { %p1087_p4 = scmp.ne.s32.totalorder %s1300_s14, %s1086_s23  ;;  %p1091_p9 = scmp.lt.s32.totalorder %s1300_s14, %s1350_s2 }
  0xfe   : > { %p1092_p10 = scmp.lt.s32.totalorder %s1090_s26, %s1086_s23 }
  0xff   : > { %p1088_p7 = pnand %p1087_p4, %p1190_p5 }
 0x100   : > { %p1093_p11 = por %p1092_p10, %p1091_p9 }
 0x101   : > { %p1089_p8 = pneg %p1088_p7 }
 0x103   : > { %p1094_p12 = pnand %p1093_p11, %p1089_p8 }
 0x105   : > { %1097 = shalt.err (!%p1094_p12)
}
 0x106   : > { %s1135_s29 = smov 64   ;;  %s1136_s30 = smov 4  }
 0x107   : > { %1031 = dma.vmem_to_hbm [thread:$0]  (%p1190_p5), %s1302_s6, 2048, %s1300_s14, %s1308_s13, %s1135_s29, %s1135_s29, %s1136_s30  }
 0x108 PF: > { %p1037_p13 = scmp.ge.s32.totalorder %s1132_s12, 2  ;;  %s690_s3 = sand.u32 1, %s1120_s9  }
 0x109   : > { %s691_s4 = scalar_lea.sflag [#allocation3], %s690_s3 }
 0x10a   : > { %p1034_p0 = pnand %p1037_p13, %p1194_p6 }
 0x10c   : > { %p1035_p1 = pneg %p1034_p0 }
 0x10e   : > { %1115 = dma.done.wait (%p1035_p1), %s691_s4, 2048  }
 0x10f   : > { %1117 = vsyncadd (%p1035_p1), %s691_s4, 4294965248  ;;  %p12_p2 = scmp.ge.s32.totalorder %s1177_s15, 4   ;;  %s1353_s9 = smov %s1124_s10 }
 0x110   : > { %s1354_s10 = smov %s1128_s11  ;;  %s1355_s11 = smov %s1188_s18 }
 0x111   : > { %s1356_s12 = smov %s1177_s15  ;;  %14 = sbr.rel (!%p12_p2) target bundleno = 3 (0x3), region = 63 }
 0x116   :  { %696 = vsyncpa [#allocation3], 1 }
 0x117   :  { %698 = vsyncpa [#allocation3 + $0x1], 1 }

</bundles_post_ra>
